<compile_context>
chip_gen: v6e
topology: v6e:2x2x1
jax: 0.10.0
libtpu: 0.0.40
codegen_flags: <defaults>
</compile_context>

<pallas_src>
import functools

import jax
import jax.numpy as jnp
from jax.experimental import pallas as pl
from jax.experimental.pallas import tpu as pltpu


# ---------------------------------------------------------------------------
# Fused kernel: one batch element per grid step, 4 MXU passes total.
# ---------------------------------------------------------------------------
def fused_mhca_kernel(
    q_ref, k_ref, v_ref, bias_ref,
    gamma_ref, beta_ref,
    wqkv_ref, bqkv_ref, wo_ref, bo_ref,
    out_ref, *probs_refs,
    num_heads,
):
    s = q_ref.shape[1]
    hidden = wo_ref.shape[0]
    dh = hidden // num_heads

    gamma = gamma_ref[...]          # (1, Din)
    beta = beta_ref[...]            # (1, Din)

    # LayerNorm (eps=1e-5, F.layer_norm default) over the stacked [q; k; v]
    # rows, so the Q/K/V projection below is a single MXU pass.
    x3 = jnp.concatenate([q_ref[0], k_ref[0], v_ref[0]], axis=0)      # (3S, Din)
    mean = jnp.mean(x3, axis=-1, keepdims=True)
    var = jnp.mean((x3 - mean) ** 2, axis=-1, keepdims=True)
    xn = (x3 - mean) * jax.lax.rsqrt(var + 1e-5) * gamma + beta

    # Fused QKV projection: (3S, Din) @ (Din, 3*hidden), f32 accumulation.
    # Only the diagonal (S, hidden) blocks are kept; off-diagonal FLOPs are
    # free (the pass is padded to the 128-wide MXU tile anyway).
    r = jnp.dot(xn, wqkv_ref[...], preferred_element_type=jnp.float32)
    r = r + bqkv_ref[...]                                             # [bq|bk|bv]
    qp = r[0:s, 0:hidden]                  # (S, hidden)
    kp = r[s:2 * s, hidden:2 * hidden]
    vp = r[2 * s:3 * s, 2 * hidden:3 * hidden]

    # Head-packed layout: (S, H*Dh) -> (H*S, Dh), head-major rows.  Done once
    # per tensor (instead of per-head lane slices inside the attention loop).
    def pack(x):
        return jnp.concatenate(
            [x[:, h * dh:(h + 1) * dh] for h in range(num_heads)], axis=0)

    q_pk = pack(qp)
    k_pk = pack(kp)
    v_pk = pack(vp)

    # One scores matmul for all heads: (H*S, Dh) @ (Dh, H*S), no explicit K^T.
    # NOTE: no 1/sqrt(Dh) scaling — matches the PyTorch module exactly.
    scores = jax.lax.dot_general(
        q_pk, k_pk, (((1,), (1,)), ((), ())),
        preferred_element_type=jnp.float32)                           # (HS, HS)
    # Hoisted additive bias (precomputed per batch in the wrapper): 0 on the
    # per-head diagonal blocks for kept keys, -1e30 everywhere else (cross-head
    # blocks and masked keys) -> full-row softmax below is exactly per-head.
    scores = scores + bias_ref[0]

    # Softmax in f32: masked / cross-head entries underflow to exactly 0.
    mx = jnp.max(scores, axis=-1, keepdims=True)
    e = jnp.exp(scores - mx)
    denom = jnp.sum(e, axis=-1, keepdims=True)
    # TODO(synk): use pl.reciprocal(denom, approx=True) in a relaxed-precision
    # perf config; exact division keeps the strict parity check below.
    p = e / denom                                                     # (HS, HS)

    if probs_refs:                 # static: probs output requested
        probs_refs[0][0] = p       # single lane-dense (HS, HS) store

    # One P@V matmul for all heads (cross-head probs are exactly 0).
    ctx_pk = jnp.dot(p, v_pk, preferred_element_type=jnp.float32)     # (HS, Dh)
    # Unpack back to (S, H*Dh) once, then ONE output-projection MXU pass.
    ctx = jnp.concatenate(
        [ctx_pk[h * s:(h + 1) * s, :] for h in range(num_heads)], axis=1)
    out_ref[0] = (jnp.dot(ctx, wo_ref[...], preferred_element_type=jnp.float32)
                  + bo_ref[...])


# ---------------------------------------------------------------------------
# Wrapper: single pallas_call for the whole forward.
# ---------------------------------------------------------------------------
def multi_head_cross_attention(query, key, value, params, num_heads, mask=None,
                               *, return_probs=True):
    b, s, d_in = query.shape
    hidden = params["wq"].shape[0]
    # The PyTorch module builds LayerNorm(hidden_dim) but applies it to the raw
    # inputs (last dim = input_dim) — only valid when input_dim == hidden_dim.
    assert d_in == hidden, "module requires input_dim == hidden_dim"
    assert hidden % num_heads == 0
    hs = num_heads * s
    f32 = jnp.float32

    if mask is None:
        mask = jnp.ones((b, s), f32)

    # Packed additive bias (B, H*S, H*S): 0 where (same head-block AND key
    # kept), -1e30 otherwise.  Built once here; the kernel adds a full tile.
    head_block = jnp.kron(jnp.eye(num_heads, dtype=f32), jnp.ones((s, s), f32))
    key_keep = jnp.tile(mask.astype(f32), (1, num_heads))             # (B, HS)
    keep = head_block[None, :, :] * key_keep[:, None, :]              # (B, HS, HS)
    bias_packed = jnp.where(keep > 0, f32(0.0), f32(-1e30)).astype(f32)

    gamma = params["gamma"].reshape(1, d_in).astype(f32)
    beta = params["beta"].reshape(1, d_in).astype(f32)
    # Column-concatenated QKV weight (in, 3*out) and bias, pre-built once.
    wqkv_t = jnp.concatenate(
        [params["wq"].T, params["wk"].T, params["wv"].T], axis=1).astype(f32)
    bqkv = jnp.concatenate(
        [params["bq"], params["bk"], params["bv"]]).reshape(1, 3 * hidden).astype(f32)
    wo_t = params["wo"].T.astype(f32)
    bo = params["bo"].reshape(1, hidden).astype(f32)

    kernel = functools.partial(fused_mhca_kernel, num_heads=num_heads)

    act_spec = pl.BlockSpec((1, s, d_in), lambda i: (i, 0, 0))
    full2d = lambda shape: pl.BlockSpec(shape, lambda i: (0, 0))

    out_shape = [jax.ShapeDtypeStruct((b, s, hidden), f32)]
    out_specs = [pl.BlockSpec((1, s, hidden), lambda i: (i, 0, 0))]
    if return_probs:
        out_shape.append(jax.ShapeDtypeStruct((b, hs, hs), f32))
        out_specs.append(pl.BlockSpec((1, hs, hs), lambda i: (i, 0, 0)))

    results = pl.pallas_call(
        kernel,
        out_shape=tuple(out_shape),
        grid=(b,),
        in_specs=[
            act_spec,                                        # query
            act_spec,                                        # key
            act_spec,                                        # value
            pl.BlockSpec((1, hs, hs), lambda i: (i, 0, 0)),  # packed mask bias
            full2d((1, d_in)),                               # gamma
            full2d((1, d_in)),                               # beta
            full2d((d_in, 3 * hidden)),                      # [Wq|Wk|Wv]^T
            full2d((1, 3 * hidden)),                         # [bq|bk|bv]
            full2d((hidden, hidden)),                        # Wo^T
            full2d((1, hidden)),                             # bo
        ],
        out_specs=tuple(out_specs),
        compiler_params=pltpu.CompilerParams(
            dimension_semantics=("parallel",),   # v7x: shard batch over 2 TCs
        ),
    )(query, key, value, bias_packed, gamma, beta, wqkv_t, bqkv, wo_t, bo)

    if not return_probs:
        return results[0]

    out, probs_packed = results
    # Extract the per-head diagonal blocks: (B, HS, HS) -> (B, H, S, S).
    idx = jnp.arange(num_heads)
    pp = probs_packed.reshape(b, num_heads, s, num_heads, s)
    probs = pp[:, idx, :, idx, :].transpose(1, 0, 2, 3)
    return out, probs


# ---------------------------------------------------------------------------
# Pure-JAX reference (mirrors the PyTorch module; correctness check only)
# ---------------------------------------------------------------------------
def reference_forward(query, key, value, params, num_heads, mask):
    def ln(x):
        mean = x.mean(-1, keepdims=True)
        var = ((x - mean) ** 2).mean(-1, keepdims=True)
        return (x - mean) / jnp.sqrt(var + 1e-5) * params["gamma"] + params["beta"]

    b, s, _ = query.shape
    hidden = params["wq"].shape[0]
    h = num_heads
    dh = hidden // h

    q = ln(query) @ params["wq"].T + params["bq"]
    k = ln(key) @ params["wk"].T + params["bk"]
    v = ln(value) @ params["wv"].T + params["bv"]
    q = q.reshape(b, s, h, dh).transpose(0, 2, 1, 3)
    k = k.reshape(b, s, h, dh).transpose(0, 2, 1, 3)
    v = v.reshape(b, s, h, dh).transpose(0, 2, 1, 3)
    scores = jnp.einsum("bhqd,bhkd->bhqk", q, k)
    scores = jnp.where(mask[:, None, None, :] == 0, -jnp.inf, scores)
    probs = jax.nn.softmax(scores, axis=-1)
    ctx = jnp.einsum("bhqk,bhkd->bhqd", probs, v)
    ctx = ctx.transpose(0, 2, 1, 3).reshape(b, s, hidden)
    out = ctx @ params["wo"].T + params["bo"]
    return out, probs


# ---------------------------------------------------------------------------
# Main
# ---------------------------------------------------------------------------
if __name__ == "__main__":
    B, S = 2, 8
    INPUT_DIM = HIDDEN_DIM = 32       # must be equal (see module note above)
    NUM_HEADS = 4

    key0 = jax.random.PRNGKey(0)
    ks = jax.random.split(key0, 12)

    def init_w(k, shape, scale=0.1):
        return jax.random.normal(k, shape, dtype=jnp.float32) * scale

    params = {
        "gamma": jnp.ones((HIDDEN_DIM,), jnp.float32),   # LayerNorm gamma (ones)
        "beta": jnp.zeros((HIDDEN_DIM,), jnp.float32),   # LayerNorm beta buffer
        "wq": init_w(ks[0], (HIDDEN_DIM, INPUT_DIM)),
        "bq": init_w(ks[1], (HIDDEN_DIM,)),
        "wk": init_w(ks[2], (HIDDEN_DIM, INPUT_DIM)),
        "bk": init_w(ks[3], (HIDDEN_DIM,)),
        "wv": init_w(ks[4], (HIDDEN_DIM, INPUT_DIM)),
        "bv": init_w(ks[5], (HIDDEN_DIM,)),
        "wo": init_w(ks[6], (HIDDEN_DIM, HIDDEN_DIM)),
        "bo": init_w(ks[7], (HIDDEN_DIM,)),
    }

    query = jax.random.normal(ks[8], (B, S, INPUT_DIM), jnp.float32)
    key_in = jax.random.normal(ks[9], (B, S, INPUT_DIM), jnp.float32)
    value = jax.random.normal(ks[10], (B, S, INPUT_DIM), jnp.float32)
    # Mask of shape (B, S): 1 = keep, 0 = masked-out key position.
    mask = (jax.random.uniform(ks[11], (B, S)) > 0.3).astype(jnp.float32)
    mask = mask.at[:, 0].set(1.0)     # ensure at least one valid key per batch

    ref_out, ref_probs = reference_forward(
        query, key_in, value, params, NUM_HEADS, mask
    )

    # ---- full forward (out + probs) ----
    out, probs = multi_head_cross_attention(
        query, key_in, value, params, NUM_HEADS, mask
    )
    out = jax.block_until_ready(out)
    probs = jax.block_until_ready(probs)

    assert out.shape == (B, S, HIDDEN_DIM)
    assert probs.shape == (B, NUM_HEADS, S, S)
    assert jnp.allclose(out, ref_out, atol=1e-4, rtol=1e-4)
    assert jnp.allclose(probs, ref_probs, atol=1e-5, rtol=1e-5)

    # ---- out-only path (probs output dropped -> no probs HBM writeback) ----
    out_only = multi_head_cross_attention(
        query, key_in, value, params, NUM_HEADS, mask, return_probs=False
    )
    out_only = jax.block_until_ready(out_only)
    assert jnp.allclose(out_only, ref_out, atol=1e-4, rtol=1e-4)

    print("KERNEL_OK")
</pallas_src>

<mosaic_0001>
module attributes {stable_mosaic.version = 11 : i64} {
  func.func @fused_mhca_kernel(%arg0: i32, %arg1: memref<1x8x32xf32, #tpu.memory_space<vmem>>, %arg2: memref<1x8x32xf32, #tpu.memory_space<vmem>>, %arg3: memref<1x8x32xf32, #tpu.memory_space<vmem>>, %arg4: memref<1x32x32xf32, #tpu.memory_space<vmem>>, %arg5: memref<1x32xf32, #tpu.memory_space<vmem>>, %arg6: memref<1x32xf32, #tpu.memory_space<vmem>>, %arg7: memref<32x96xf32, #tpu.memory_space<vmem>>, %arg8: memref<1x96xf32, #tpu.memory_space<vmem>>, %arg9: memref<32x32xf32, #tpu.memory_space<vmem>>, %arg10: memref<1x32xf32, #tpu.memory_space<vmem>>, %arg11: memref<1x8x32xf32, #tpu.memory_space<vmem>>, %arg12: memref<1x32x32xf32, #tpu.memory_space<vmem>>) attributes {dimension_semantics = [#tpu.dimension_semantics<parallel>], iteration_bounds = array<i64: 2>, scalar_prefetch = 0 : i64, scratch_operands = 0 : i64, tpu.core_type = #tpu.core_type<tc>, window_params = [{transform_indices = @transform_0, window_bounds = array<i64: 1, 8, 32>}, {transform_indices = @transform_1, window_bounds = array<i64: 1, 8, 32>}, {transform_indices = @transform_2, window_bounds = array<i64: 1, 8, 32>}, {transform_indices = @transform_3, window_bounds = array<i64: 1, 32, 32>}, {pipeline_mode = #tpu.pipeline_mode<synchronous>, transform_indices = @transform_4, window_bounds = array<i64: 1, 32>}, {pipeline_mode = #tpu.pipeline_mode<synchronous>, transform_indices = @transform_5, window_bounds = array<i64: 1, 32>}, {pipeline_mode = #tpu.pipeline_mode<synchronous>, transform_indices = @transform_6, window_bounds = array<i64: 32, 96>}, {pipeline_mode = #tpu.pipeline_mode<synchronous>, transform_indices = @transform_7, window_bounds = array<i64: 1, 96>}, {pipeline_mode = #tpu.pipeline_mode<synchronous>, transform_indices = @transform_8, window_bounds = array<i64: 32, 32>}, {pipeline_mode = #tpu.pipeline_mode<synchronous>, transform_indices = @transform_9, window_bounds = array<i64: 1, 32>}, {transform_indices = @transform_10, window_bounds = array<i64: 1, 8, 32>}, {transform_indices = @transform_11, window_bounds = array<i64: 1, 32, 32>}]} {
    %c0 = arith.constant 0 : index
    %c0_0 = arith.constant 0 : index
    %0 = vector.load %arg5[%c0, %c0_0] : memref<1x32xf32, #tpu.memory_space<vmem>>, vector<1x32xf32>
    %c0_1 = arith.constant 0 : index
    %c0_2 = arith.constant 0 : index
    %1 = vector.load %arg6[%c0_1, %c0_2] : memref<1x32xf32, #tpu.memory_space<vmem>>, vector<1x32xf32>
    %c0_3 = arith.constant 0 : index
    %c0_4 = arith.constant 0 : index
    %c0_5 = arith.constant 0 : index
    %2 = vector.load %arg1[%c0_3, %c0_4, %c0_5] : memref<1x8x32xf32, #tpu.memory_space<vmem>>, vector<1x8x32xf32>
    %3 = vector.shape_cast %2 : vector<1x8x32xf32> to vector<8x32xf32>
    %c0_6 = arith.constant 0 : index
    %c0_7 = arith.constant 0 : index
    %c0_8 = arith.constant 0 : index
    %4 = vector.load %arg2[%c0_6, %c0_7, %c0_8] : memref<1x8x32xf32, #tpu.memory_space<vmem>>, vector<1x8x32xf32>
    %5 = vector.shape_cast %4 : vector<1x8x32xf32> to vector<8x32xf32>
    %c0_9 = arith.constant 0 : index
    %c0_10 = arith.constant 0 : index
    %c0_11 = arith.constant 0 : index
    %6 = vector.load %arg3[%c0_9, %c0_10, %c0_11] : memref<1x8x32xf32, #tpu.memory_space<vmem>>, vector<1x8x32xf32>
    %7 = vector.shape_cast %6 : vector<1x8x32xf32> to vector<8x32xf32>
    %8 = tpu.concatenate %3, %5, %7 in 0 : vector<8x32xf32>, vector<8x32xf32>, vector<8x32xf32> -> vector<24x32xf32>
    %cst = arith.constant dense<0.000000e+00> : vector<24xf32>
    %9 = vector.multi_reduction <add>, %8, %cst [1] : vector<24x32xf32> to vector<24xf32>
    %10 = vector.shape_cast %9 : vector<24xf32> to vector<24x1xf32>
    %cst_12 = arith.constant 3.200000e+01 : f32
    %11 = vector.broadcast %cst_12 : f32 to vector<24x1xf32>
    %12 = arith.divf %10, %11 : vector<24x1xf32>
    %13 = vector.broadcast %12 : vector<24x1xf32> to vector<24x32xf32>
    %14 = arith.subf %8, %13 : vector<24x32xf32>
    %15 = arith.mulf %14, %14 : vector<24x32xf32>
    %cst_13 = arith.constant dense<0.000000e+00> : vector<24xf32>
    %16 = vector.multi_reduction <add>, %15, %cst_13 [1] : vector<24x32xf32> to vector<24xf32>
    %17 = vector.shape_cast %16 : vector<24xf32> to vector<24x1xf32>
    %cst_14 = arith.constant 3.200000e+01 : f32
    %18 = vector.broadcast %cst_14 : f32 to vector<24x1xf32>
    %19 = arith.divf %17, %18 : vector<24x1xf32>
    %20 = vector.broadcast %12 : vector<24x1xf32> to vector<24x32xf32>
    %21 = arith.subf %8, %20 : vector<24x32xf32>
    %cst_15 = arith.constant 9.99999974E-6 : f32
    %22 = vector.broadcast %cst_15 : f32 to vector<24x1xf32>
    %23 = arith.addf %19, %22 : vector<24x1xf32>
    %24 = math.rsqrt %23 : vector<24x1xf32>
    %25 = vector.broadcast %24 : vector<24x1xf32> to vector<24x32xf32>
    %26 = arith.mulf %21, %25 : vector<24x32xf32>
    %27 = vector.broadcast %0 : vector<1x32xf32> to vector<24x32xf32>
    %28 = arith.mulf %26, %27 : vector<24x32xf32>
    %29 = vector.broadcast %1 : vector<1x32xf32> to vector<24x32xf32>
    %30 = arith.addf %28, %29 : vector<24x32xf32>
    %c0_16 = arith.constant 0 : index
    %c0_17 = arith.constant 0 : index
    %31 = vector.load %arg7[%c0_16, %c0_17] : memref<32x96xf32, #tpu.memory_space<vmem>>, vector<32x96xf32>
    %cst_18 = arith.constant dense<0.000000e+00> : vector<24x96xf32>
    %32 = tpu.matmul %30, %31, %cst_18 {dimension_numbers = #tpu.dot_dimension_numbers<[1], [0], [0], [1], [0, 0, 1, 1], [], []>} : vector<24x32xf32>, vector<32x96xf32>, vector<24x96xf32> -> vector<24x96xf32>
    %c0_19 = arith.constant 0 : index
    %c0_20 = arith.constant 0 : index
    %33 = vector.load %arg8[%c0_19, %c0_20] : memref<1x96xf32, #tpu.memory_space<vmem>>, vector<1x96xf32>
    %34 = vector.broadcast %33 : vector<1x96xf32> to vector<24x96xf32>
    %35 = arith.addf %32, %34 : vector<24x96xf32>
    %36 = vector.extract_strided_slice %35 {offsets = [0, 0], sizes = [8, 32], strides = [1, 1]} : vector<24x96xf32> to vector<8x32xf32>
    %37 = vector.extract_strided_slice %35 {offsets = [8, 32], sizes = [8, 32], strides = [1, 1]} : vector<24x96xf32> to vector<8x32xf32>
    %38 = vector.extract_strided_slice %35 {offsets = [16, 64], sizes = [8, 32], strides = [1, 1]} : vector<24x96xf32> to vector<8x32xf32>
    %39 = vector.extract_strided_slice %36 {offsets = [0, 0], sizes = [8, 8], strides = [1, 1]} : vector<8x32xf32> to vector<8x8xf32>
    %40 = vector.extract_strided_slice %36 {offsets = [0, 8], sizes = [8, 8], strides = [1, 1]} : vector<8x32xf32> to vector<8x8xf32>
    %41 = vector.extract_strided_slice %36 {offsets = [0, 16], sizes = [8, 8], strides = [1, 1]} : vector<8x32xf32> to vector<8x8xf32>
    %42 = vector.extract_strided_slice %36 {offsets = [0, 24], sizes = [8, 8], strides = [1, 1]} : vector<8x32xf32> to vector<8x8xf32>
    %43 = tpu.concatenate %39, %40, %41, %42 in 0 : vector<8x8xf32>, vector<8x8xf32>, vector<8x8xf32>, vector<8x8xf32> -> vector<32x8xf32>
    %44 = vector.extract_strided_slice %37 {offsets = [0, 0], sizes = [8, 8], strides = [1, 1]} : vector<8x32xf32> to vector<8x8xf32>
    %45 = vector.extract_strided_slice %37 {offsets = [0, 8], sizes = [8, 8], strides = [1, 1]} : vector<8x32xf32> to vector<8x8xf32>
    %46 = vector.extract_strided_slice %37 {offsets = [0, 16], sizes = [8, 8], strides = [1, 1]} : vector<8x32xf32> to vector<8x8xf32>
    %47 = vector.extract_strided_slice %37 {offsets = [0, 24], sizes = [8, 8], strides = [1, 1]} : vector<8x32xf32> to vector<8x8xf32>
    %48 = tpu.concatenate %44, %45, %46, %47 in 0 : vector<8x8xf32>, vector<8x8xf32>, vector<8x8xf32>, vector<8x8xf32> -> vector<32x8xf32>
    %49 = vector.extract_strided_slice %38 {offsets = [0, 0], sizes = [8, 8], strides = [1, 1]} : vector<8x32xf32> to vector<8x8xf32>
    %50 = vector.extract_strided_slice %38 {offsets = [0, 8], sizes = [8, 8], strides = [1, 1]} : vector<8x32xf32> to vector<8x8xf32>
    %51 = vector.extract_strided_slice %38 {offsets = [0, 16], sizes = [8, 8], strides = [1, 1]} : vector<8x32xf32> to vector<8x8xf32>
    %52 = vector.extract_strided_slice %38 {offsets = [0, 24], sizes = [8, 8], strides = [1, 1]} : vector<8x32xf32> to vector<8x8xf32>
    %53 = tpu.concatenate %49, %50, %51, %52 in 0 : vector<8x8xf32>, vector<8x8xf32>, vector<8x8xf32>, vector<8x8xf32> -> vector<32x8xf32>
    %cst_21 = arith.constant dense<0.000000e+00> : vector<32x32xf32>
    %54 = tpu.matmul %43, %48, %cst_21 {dimension_numbers = #tpu.dot_dimension_numbers<[1], [1], [0], [0], [0, 0, 1, 0], [], []>} : vector<32x8xf32>, vector<32x8xf32>, vector<32x32xf32> -> vector<32x32xf32>
    %c0_22 = arith.constant 0 : index
    %c0_23 = arith.constant 0 : index
    %c0_24 = arith.constant 0 : index
    %55 = vector.load %arg4[%c0_22, %c0_23, %c0_24] : memref<1x32x32xf32, #tpu.memory_space<vmem>>, vector<1x32x32xf32>
    %56 = vector.shape_cast %55 : vector<1x32x32xf32> to vector<32x32xf32>
    %57 = arith.addf %54, %56 : vector<32x32xf32>
    %cst_25 = arith.constant dense<0xFF800000> : vector<32xf32>
    %58 = vector.multi_reduction <maximumf>, %57, %cst_25 [1] : vector<32x32xf32> to vector<32xf32>
    %59 = vector.shape_cast %58 : vector<32xf32> to vector<32x1xf32>
    %60 = vector.broadcast %59 : vector<32x1xf32> to vector<32x32xf32>
    %61 = arith.subf %57, %60 : vector<32x32xf32>
    %62 = math.exp %61 : vector<32x32xf32>
    %cst_26 = arith.constant dense<0.000000e+00> : vector<32xf32>
    %63 = vector.multi_reduction <add>, %62, %cst_26 [1] : vector<32x32xf32> to vector<32xf32>
    %64 = vector.shape_cast %63 : vector<32xf32> to vector<32x1xf32>
    %65 = vector.broadcast %64 : vector<32x1xf32> to vector<32x32xf32>
    %66 = arith.divf %62, %65 : vector<32x32xf32>
    %c0_27 = arith.constant 0 : index
    %c0_28 = arith.constant 0 : index
    %c0_29 = arith.constant 0 : index
    %67 = vector.load %arg12[%c0_27, %c0_28, %c0_29] : memref<1x32x32xf32, #tpu.memory_space<vmem>>, vector<1x32x32xf32>
    %68 = vector.shape_cast %67 : vector<1x32x32xf32> to vector<32x32xf32>
    %69 = vector.shape_cast %66 : vector<32x32xf32> to vector<1x32x32xf32>
    tpu.vector_store %arg12[%c0_27, %c0_28, %c0_29], %69 {strides = array<i32>} : memref<1x32x32xf32, #tpu.memory_space<vmem>>, vector<1x32x32xf32>,
    %cst_30 = arith.constant dense<0.000000e+00> : vector<32x8xf32>
    %70 = tpu.matmul %66, %53, %cst_30 {dimension_numbers = #tpu.dot_dimension_numbers<[1], [0], [0], [1], [0, 0, 1, 1], [], []>} : vector<32x32xf32>, vector<32x8xf32>, vector<32x8xf32> -> vector<32x8xf32>
    %71 = vector.extract_strided_slice %70 {offsets = [0, 0], sizes = [8, 8], strides = [1, 1]} : vector<32x8xf32> to vector<8x8xf32>
    %72 = vector.extract_strided_slice %70 {offsets = [8, 0], sizes = [8, 8], strides = [1, 1]} : vector<32x8xf32> to vector<8x8xf32>
    %73 = vector.extract_strided_slice %70 {offsets = [16, 0], sizes = [8, 8], strides = [1, 1]} : vector<32x8xf32> to vector<8x8xf32>
    %74 = vector.extract_strided_slice %70 {offsets = [24, 0], sizes = [8, 8], strides = [1, 1]} : vector<32x8xf32> to vector<8x8xf32>
    %75 = tpu.concatenate %71, %72, %73, %74 in 1 : vector<8x8xf32>, vector<8x8xf32>, vector<8x8xf32>, vector<8x8xf32> -> vector<8x32xf32>
    %c0_31 = arith.constant 0 : index
    %c0_32 = arith.constant 0 : index
    %76 = vector.load %arg9[%c0_31, %c0_32] : memref<32x32xf32, #tpu.memory_space<vmem>>, vector<32x32xf32>
    %cst_33 = arith.constant dense<0.000000e+00> : vector<8x32xf32>
    %77 = tpu.matmul %75, %76, %cst_33 {dimension_numbers = #tpu.dot_dimension_numbers<[1], [0], [0], [1], [0, 0, 1, 1], [], []>} : vector<8x32xf32>, vector<32x32xf32>, vector<8x32xf32> -> vector<8x32xf32>
    %c0_34 = arith.constant 0 : index
    %c0_35 = arith.constant 0 : index
    %78 = vector.load %arg10[%c0_34, %c0_35] : memref<1x32xf32, #tpu.memory_space<vmem>>, vector<1x32xf32>
    %79 = vector.broadcast %78 : vector<1x32xf32> to vector<8x32xf32>
    %80 = arith.addf %77, %79 : vector<8x32xf32>
    %c0_36 = arith.constant 0 : index
    %c0_37 = arith.constant 0 : index
    %c0_38 = arith.constant 0 : index
    %81 = vector.load %arg11[%c0_36, %c0_37, %c0_38] : memref<1x8x32xf32, #tpu.memory_space<vmem>>, vector<1x8x32xf32>
    %82 = vector.shape_cast %81 : vector<1x8x32xf32> to vector<8x32xf32>
    %83 = vector.shape_cast %80 : vector<8x32xf32> to vector<1x8x32xf32>
    tpu.vector_store %arg11[%c0_36, %c0_37, %c0_38], %83 {strides = array<i32>} : memref<1x8x32xf32, #tpu.memory_space<vmem>>, vector<1x8x32xf32>,
    return
  }
  func.func @transform_0(%arg0: i32) -> (i32, i32, i32) {
    %c0_i32 = arith.constant 0 : i32
    %c0_i32_0 = arith.constant 0 : i32
    %c0_i32_1 = arith.constant 0 : i32
    return %arg0, %c0_i32, %c0_i32_0 : i32, i32, i32
  }
  func.func @transform_1(%arg0: i32) -> (i32, i32, i32) {
    %c0_i32 = arith.constant 0 : i32
    %c0_i32_0 = arith.constant 0 : i32
    %c0_i32_1 = arith.constant 0 : i32
    return %arg0, %c0_i32, %c0_i32_0 : i32, i32, i32
  }
  func.func @transform_2(%arg0: i32) -> (i32, i32, i32) {
    %c0_i32 = arith.constant 0 : i32
    %c0_i32_0 = arith.constant 0 : i32
    %c0_i32_1 = arith.constant 0 : i32
    return %arg0, %c0_i32, %c0_i32_0 : i32, i32, i32
  }
  func.func @transform_3(%arg0: i32) -> (i32, i32, i32) {
    %c0_i32 = arith.constant 0 : i32
    %c0_i32_0 = arith.constant 0 : i32
    %c0_i32_1 = arith.constant 0 : i32
    return %arg0, %c0_i32, %c0_i32_0 : i32, i32, i32
  }
  func.func @transform_4(%arg0: i32) -> (i32, i32) {
    %c0_i32 = arith.constant 0 : i32
    %c0_i32_0 = arith.constant 0 : i32
    %c0_i32_1 = arith.constant 0 : i32
    return %c0_i32, %c0_i32_0 : i32, i32
  }
  func.func @transform_5(%arg0: i32) -> (i32, i32) {
    %c0_i32 = arith.constant 0 : i32
    %c0_i32_0 = arith.constant 0 : i32
    %c0_i32_1 = arith.constant 0 : i32
    return %c0_i32, %c0_i32_0 : i32, i32
  }
  func.func @transform_6(%arg0: i32) -> (i32, i32) {
    %c0_i32 = arith.constant 0 : i32
    %c0_i32_0 = arith.constant 0 : i32
    %c0_i32_1 = arith.constant 0 : i32
    return %c0_i32, %c0_i32_0 : i32, i32
  }
  func.func @transform_7(%arg0: i32) -> (i32, i32) {
    %c0_i32 = arith.constant 0 : i32
    %c0_i32_0 = arith.constant 0 : i32
    %c0_i32_1 = arith.constant 0 : i32
    return %c0_i32, %c0_i32_0 : i32, i32
  }
  func.func @transform_8(%arg0: i32) -> (i32, i32) {
    %c0_i32 = arith.constant 0 : i32
    %c0_i32_0 = arith.constant 0 : i32
    %c0_i32_1 = arith.constant 0 : i32
    return %c0_i32, %c0_i32_0 : i32, i32
  }
  func.func @transform_9(%arg0: i32) -> (i32, i32) {
    %c0_i32 = arith.constant 0 : i32
    %c0_i32_0 = arith.constant 0 : i32
    %c0_i32_1 = arith.constant 0 : i32
    return %c0_i32, %c0_i32_0 : i32, i32
  }
  func.func @transform_10(%arg0: i32) -> (i32, i32, i32) {
    %c0_i32 = arith.constant 0 : i32
    %c0_i32_0 = arith.constant 0 : i32
    %c0_i32_1 = arith.constant 0 : i32
    return %arg0, %c0_i32, %c0_i32_0 : i32, i32, i32
  }
  func.func @transform_11(%arg0: i32) -> (i32, i32, i32) {
    %c0_i32 = arith.constant 0 : i32
    %c0_i32_0 = arith.constant 0 : i32
    %c0_i32_1 = arith.constant 0 : i32
    return %arg0, %c0_i32, %c0_i32_0 : i32, i32, i32
  }
}

</mosaic_0001>

<bundles_post_ra>
// kernel: tpu_custom_call.1
= control target key start
LH: loop header
LB: loop body
LE: loop exit
PB: predicated region body
PF: predicated region fallthrough
CT: control target
= control target key end

     0   :  { %s2398_s0 = inlined_call_operand.hbm [shape: f32[2,8,32], index: 0, kind: input, shape index: {}]   ;;  %s2399_s1 = inlined_call_operand.hbm [shape: f32[2,8,32], index: 1, kind: input, shape index: {}]   ;;  %s2400_s2 = inlined_call_operand.hbm [shape: f32[2,8,32], index: 2, kind: input, shape index: {}]   ;;  %s2401_s3 = inlined_call_operand.hbm [shape: f32[2,32,32], index: 3, kind: input, shape index: {}]   ;;  %s2402_s4 = inlined_call_operand.vmem [shape: f32[1,32], index: 4, kind: input, shape index: {}]   ;;  %s2403_s5 = inlined_call_operand.vmem [shape: f32[1,32], index: 5, kind: input, shape index: {}]   ;;  %s2404_s6 = inlined_call_operand.hbm [shape: f32[32,96], index: 6, kind: input, shape index: {}]   ;;  %s2405_s7 = inlined_call_operand.vmem [shape: f32[1,96], index: 7, kind: input, shape index: {}]   ;;  %s2406_s8 = inlined_call_operand.hbm [shape: f32[32,32], index: 8, kind: input, shape index: {}]   ;;  %s2407_s9 = inlined_call_operand.vmem [shape: f32[1,32], index: 9, kind: input, shape index: {}]   ;;  %s2408_s10 = inlined_call_operand.hbm [shape: f32[2,8,32], index: 10, kind: output, shape index: {0}]   ;;  %s2409_s11 = inlined_call_operand.hbm [shape: f32[2,32,32], index: 11, kind: output, shape index: {1}]  }
   0x1   :  { %2431 = sst [smem:[#allocation29_spill]] %s2399_s1 }
   0x2   :  { %2432 = sst [smem:[#allocation30_spill]] %s2403_s5 }
   0x3   :  { %2433 = sst [smem:[#allocation31_spill]] %s2404_s6 }
   0x4   :  { %2434 = sst [smem:[#allocation32_spill]] %s2405_s7 }
   0x5   :  { %2435 = sst [smem:[#allocation33_spill]] %s2406_s8 }
   0x6   :  { %2436 = sst [smem:[#allocation34_spill]] %s2407_s9 }
   0x7   :  { %2437 = sst [smem:[#allocation35_spill]] %s2408_s10 }
   0x8   :  { %2438 = sst [smem:[#allocation36_spill]] %s2409_s11 }
   0x9   :  { %17 = vsyncpa [#allocation3], 0 }
   0xa   :  { %19 = vsyncpa [#allocation3 + $0x1], 0 }
   0xb   :  { %20 = vsyncpa [#allocation6], 0 }
   0xc   :  { %22 = vsyncpa [#allocation6 + $0x1], 0 }
   0xd   :  { %23 = vsyncpa [#allocation9], 0 }
   0xe   :  { %25 = vsyncpa [#allocation9 + $0x1], 0 }
   0xf   :  { %26 = vsyncpa [#allocation12], 0 }
  0x10   :  { %27 = vsyncpa [#allocation4], 0 }
  0x11   :  { %29 = vsyncpa [#allocation4 + $0x1], 0 }
  0x12   :  { %30 = vsyncpa [#allocation15], 0 }
  0x13   :  { %32 = vsyncpa [#allocation15 + $0x1], 0  ;;  %s1948_s17 = smov 0   ;;  %s1950_s18 = smov 0  }
  0x14   :  { %s1952_s19 = smov 0   ;;  %s1954_s20 = smov 0  }
  0x15 LB: > { %2439 = sst [smem:[#allocation23_spill]] %s1853_s17  ;;  %s1969_s21 = sadd.s32 4294967295, %s1865_s20   ;;  %s1865_s20 = sphi %s1954_s20, %s2477_s20   ;;  %s1861_s19 = sphi %s1952_s19, %s2479_s19   ;;  %s1857_s18 = sphi %s1950_s18, %s2481_s18   ;;  %s1853_s17 = sphi %s1948_s17, %s2480_s17  }
  0x16   : > { %2440 = sst [smem:[#allocation24_spill]] %s1861_s19  ;;  %s1333_s22 = sadd.s32 4294967294, %s1865_s20  }
  0x17   : > { %p58_p0 = scmp.ne.s32.totalorder %s1857_s18, %s1853_s17  ;;  %p2420_p1 = scmp.eq.s32.totalorder %s1969_s21, 0 }
  0x18   : > { %p286_p2 = scmp.eq.s32.totalorder %s1969_s21, 1  ;;  %p292_p3 = scmp.eq.s32.totalorder %s1333_s22, 1 }
  0x19   : > { %p1978_p4 = por %p2420_p1, %p58_p0  ;;  %p1334_p5 = scmp.ge.s32.totalorder %s1865_s20, 1 }
  0x1a   : > { %p1983_p6 = por %p292_p3, %p58_p0  ;;  %p325_p7 = scmp.lt.s32.totalorder %s1865_s20, 3 }
  0x1b   : > { %s2441_s23 = scalar_select %p1978_p4, 1, 0 }
  0x1c   : > { %s2442_s24 = scalar_select %p1983_p6, 1, 0 }
  0x1d   : > { %p1988_p8 = pnand %p1334_p5, %p325_p7  ;;  %s1867_s26 = smov [#allocation10]  }
  0x1e   : > { %2443 = sst [smem:[#allocation25_spill]] %s2442_s24  ;;  %s343_s27 = sshll.u32 %s1867_s26, 4  ;;  %s344_s27 = int_to_ptr.vmem [resolvable:$true] %s343_s27 }
  0x1f   : > { %s2444_s25 = scalar_select %p1988_p8, 1, 0 }
  0x20   : > { %p1489_p9 = pneg %p1988_p8  ;;  %s2002_s29 = sadd.s32 1, %s1865_s20  }
  0x21   : > { %2446 = sst [smem:[#allocation26_spill]] %s2002_s29  ;;  %s45_s30 = sadd.s32 1, %s1861_s19 }
  0x22   : > { %p1997_p11 = pnand %p1489_p9, %p2420_p1  ;;  %s42_s12 = ssub.s32 %s1865_s20, %s2002_s29 }
  0x23   : > { %s1602_s13 = scalar_lea.vmem %s344_s27, 512  ;;  %p1610_p5 = scmp.lt.s32.totalorder %s344_s27, %s344_s27 }
  0x24   : > { %s2445_s28 = scalar_select %p1997_p11, 1, 0 }
  0x25   : > { %p2421_p12 = pneg %p1997_p11  ;;  %p1603_p13 = scmp.ne.s32.totalorder %s344_s27, %s1602_s13 }
  0x26   : > { %p1611_p7 = scmp.lt.s32.totalorder %s1602_s13, %s1602_s13 }
  0x27   : > { %p1605_p0 = pnand %p1603_p13, %p2421_p12 }
  0x28   : > { %p1612_p9 = por %p1611_p7, %p1610_p5 }
  0x29   : > { %p1606_p3 = pneg %p1605_p0 }
  0x2b   : > { %p1613_p10 = pnand %p1612_p9, %p1606_p3 }
  0x2d   : > { %1616 = shalt.err (!%p1613_p10)
}
  0x2e   : > { %s2413_s14 = smov 128   ;;  %s2415_s15 = smov 8  }
  0x2f   : > { %s2447_s6 = sld [smem:[#allocation31_spill]]  ;;  %p43_p10 = scmp.eq.s32.totalorder %s42_s12, 0 }
  0x30   : > { %p52_p13 = scmp.ne.s32.totalorder %s1861_s19, %s1857_s18  ;;  %p53_p0 = scmp.eq.s32.totalorder %s1865_s20, 0 }
  0x31   : > { %p1518_p3 = scmp.lt.s32.totalorder %s1865_s20, 2  ;;  %s2034_s29 = sand.u32 1, %s1861_s19  }
  0x32   : > { %s2025_s26 = scalar_select %p43_p10, %s1861_s19, %s45_s30  }
  0x33   : > { %p54_p5 = por %p53_p0, %p52_p13  ;;  %p2029_p7 = por %p286_p2, %p52_p13 }
  0x34   : > { %2448 = sst [smem:[#allocation27_spill]] %s2025_s26  ;;  %s2037_s24 = sshll.u32 %s1865_s20, 7 }
  0x35   : > { %1492 = dma.hbm_to_vmem [thread:$0]  (!%p1997_p11), %s2447_s6, 512, %s344_s27, [#allocation9], %s2413_s14, %s2413_s14, %s2415_s15  }
  0x36   : > { %s2449_s13 = scalar_select %p2029_p7, 1, 0 }
  0x37   : > { %s2040_s27 = sshll.u32 %s2034_s29, 3  ;;  %p2042_p9 = pnand %p1518_p3, %p54_p5 }
  0x38   : > { %2450 = sst [smem:[#allocation28_spill]] %s2449_s13  ;;  %s2422_s30 = sand.u32 1, %s1865_s20  }
  0x39   : > { %s2452_s1 = sld [smem:[#allocation29_spill]]  ;;  %s398_s15 = scalar_lea.vmem [#allocation5], %s2040_s27 }
  0x3a   : > { %s405_s6 = sshll.u32 %s398_s15, 4  ;;  %s2056_s26 = scalar_lea.sflag [#allocation6], %s2422_s30  ;;  %s406_s6 = int_to_ptr.vmem [resolvable:$true] %s405_s6 }
  0x3b   : > { %p2062_p10 = pneg %p2042_p9 }
  0x3f   : > { %s2051_s14 = scalar_lea.hbm %s2452_s1, %s2037_s24  ;;  %s1622_s10 = scalar_lea.hbm %s2452_s1, 256 }
  0x40   : > { %s1617_s19 = scalar_lea.hbm %s2051_s14, 128  ;;  %p1623_p3 = scmp.lt.s32.totalorder %s2051_s14, %s2452_s1 }
  0x41   : > { %p1618_p2 = scmp.ne.s32.totalorder %s2051_s14, %s1617_s19  ;;  %p1624_p5 = scmp.lt.s32.totalorder %s1622_s10, %s1617_s19 }
  0x43   : > { %p1620_p13 = pnand %p2062_p10, %p1618_p2  ;;  %p1625_p1 = por %p1624_p5, %p1623_p3 }
  0x45   : > { %p1621_p0 = pneg %p1620_p13 }
  0x47   : > { %p1626_p12 = pnand %p1625_p1, %p1621_p0 }
  0x49   : > { %1629 = shalt.err (!%p1626_p12)
}
  0x4a   : > { %s1630_s30 = scalar_lea.vmem %s406_s6, 128  ;;  %s1870_s11 = smov [#allocation5]  }
  0x4b   : > { %p1631_p6 = scmp.ne.s32.totalorder %s406_s6, %s1630_s30  ;;  %s1635_s13 = sshll.u32 %s1870_s11, 4  ;;  %s1636_s13 = int_to_ptr.vmem [resolvable:$false] %s1635_s13 }
  0x4c   : > { %s1637_s7 = scalar_lea.vmem %s1636_s13, 256  ;;  %p1638_p2 = scmp.lt.s32.totalorder %s406_s6, %s1636_s13 }
  0x4d   : > { %p1633_p7 = pnand %p1631_p6, %p2062_p10  ;;  %p1639_p13 = scmp.lt.s32.totalorder %s1637_s7, %s1630_s30 }
  0x4f   : > { %p1634_p4 = pneg %p1633_p7  ;;  %p1640_p8 = por %p1639_p13, %p1638_p2 }
  0x51   : > { %p1641_p11 = pnand %p1640_p8, %p1634_p4 }
  0x53   : > { %1644 = shalt.err (!%p1641_p11)
}
  0x54   : > { %1502 = dma.hbm_to_vmem [thread:$0]  (!%p2042_p9), %s2051_s14, 128, %s406_s6, %s2056_s26  }
  0x55   : > { %s1344_s9 = sshll.u32 %s2034_s29, 5  ;;  %s1871_s10 = smov [#allocation11]  }
  0x56   : > { %s359_s19 = sshll.u32 %s1871_s10, 4  ;;  %s434_s16 = scalar_lea.vmem [#allocation8], %s1344_s9  ;;  %s360_s19 = int_to_ptr.vmem [resolvable:$true] %s359_s19 }
  0x57   : > { %s441_s22 = sshll.u32 %s434_s16, 4  ;;  %s1656_s11 = scalar_lea.vmem %s360_s19, 512  ;;  %s2082_s22 = int_to_ptr.vmem [resolvable:$true] %s441_s22 }
  0x58   : > { %p1657_p1 = scmp.ne.s32.totalorder %s360_s19, %s1656_s11  ;;  %p2454_p6 = scmp.ne.s32.totalorder %s2445_s28, 0 }
  0x59   : > { %p1664_p12 = scmp.lt.s32.totalorder %s360_s19, %s360_s19  ;;  %p1665_p7 = scmp.lt.s32.totalorder %s1656_s11, %s1656_s11 }
  0x5a   : > { %p2455_p4 = pneg %p2454_p6 }
  0x5b   : > { %p1666_p0 = por %p1665_p7, %p1664_p12 }
  0x5c   : > { %p1659_p8 = pnand %p1657_p1, %p2455_p4 }
  0x5e   : > { %p1660_p11 = pneg %p1659_p8 }
  0x60   : > { %p1667_p3 = pnand %p1666_p0, %p1660_p11 }
  0x62   : > { %1670 = shalt.err (!%p1667_p3)
}
  0x63   : > { %s2456_s6 = smov 8   ;;  %s2457_s7 = smov 128  }
  0x64   : > { %s2458_s8 = sld [smem:[#allocation33_spill]]  ;;  %s2099_s9 = scalar_lea.hbm %s2398_s0, %s2037_s24 }
  0x65   : > { %s380_s28 = scalar_lea.vmem [#allocation2], %s2040_s27  ;;  %s2106_s14 = scalar_lea.hbm %s2400_s2, %s2037_s24 }
  0x66   : > { %s387_s10 = sshll.u32 %s380_s28, 4  ;;  %s377_s13 = scalar_lea.sflag [#allocation3], %s2034_s29  ;;  %s388_s10 = int_to_ptr.vmem [resolvable:$true] %s387_s10 }
  0x67   : > { %s1671_s1 = scalar_lea.hbm %s2099_s9, 128  ;;  %s1676_s15 = scalar_lea.hbm %s2398_s0, 256 }
  0x68   : > { %p1672_p5 = scmp.ne.s32.totalorder %s2099_s9, %s1671_s1  ;;  %p1677_p1 = scmp.lt.s32.totalorder %s2099_s9, %s2398_s0 }
  0x6a   : > { %1495 = dma.hbm_to_vmem [thread:$0]  (!%p2454_p6), %s2458_s8, 512, %s360_s19, [#allocation12], %s2457_s7, %s2457_s7, %s2456_s6  }
  0x6b   : > { %p1674_p2 = pnand %p1672_p5, %p2062_p10  ;;  %p1678_p6 = scmp.lt.s32.totalorder %s1676_s15, %s1671_s1 }
  0x6d   : > { %p1675_p13 = pneg %p1674_p2  ;;  %p1679_p4 = por %p1678_p6, %p1677_p1 }
  0x6f   : > { %p1680_p8 = pnand %p1679_p4, %p1675_p13 }
  0x71   : > { %1683 = shalt.err (!%p1680_p8)
}
  0x72   : > { %s1684_s24 = scalar_lea.vmem %s388_s10, 128  ;;  %s1872_s29 = smov [#allocation2]  }
  0x73   : > { %p1685_p11 = scmp.ne.s32.totalorder %s388_s10, %s1684_s24  ;;  %s1689_s28 = sshll.u32 %s1872_s29, 4  ;;  %s1690_s28 = int_to_ptr.vmem [resolvable:$false] %s1689_s28 }
  0x74   : > { %s1691_s16 = scalar_lea.vmem %s1690_s28, 256  ;;  %p1692_p0 = scmp.lt.s32.totalorder %s388_s10, %s1690_s28 }
  0x75   : > { %p1687_p12 = pnand %p1685_p11, %p2062_p10  ;;  %p1693_p3 = scmp.lt.s32.totalorder %s1691_s16, %s1684_s24 }
  0x77   : > { %p1688_p7 = pneg %p1687_p12  ;;  %p1694_p5 = por %p1693_p3, %p1692_p0 }
  0x79   : > { %p1695_p2 = pnand %p1694_p5, %p1688_p7 }
  0x7b   : > { %1698 = shalt.err (!%p1695_p2)
}
  0x7c   : > { %1499 = dma.hbm_to_vmem [thread:$0]  (!%p2042_p9), %s2099_s9, 128, %s388_s10, %s377_s13  }
  0x7d   : > { %s416_s1 = scalar_lea.vmem [#allocation7], %s2040_s27  ;;  %s1383_s8 = sshll.u32 %s1865_s20, 9 }
  0x7e   : > { %s423_s5 = sshll.u32 %s416_s1, 4  ;;  %s2130_s30 = scalar_lea.hbm %s2401_s3, %s1383_s8  ;;  %s424_s5 = int_to_ptr.vmem [resolvable:$true] %s423_s5 }
  0x7f   : > { %s1699_s15 = scalar_lea.hbm %s2106_s14, 128  ;;  %s1704_s28 = scalar_lea.hbm %s2400_s2, 256 }
  0x80   : > { %p1700_p13 = scmp.ne.s32.totalorder %s2106_s14, %s1699_s15  ;;  %p1705_p4 = scmp.lt.s32.totalorder %s2106_s14, %s2400_s2 }
  0x81   : > { %p1706_p8 = scmp.lt.s32.totalorder %s1704_s28, %s1699_s15 }
  0x82   : > { %p1702_p1 = pnand %p1700_p13, %p2062_p10 }
  0x83   : > { %p1707_p11 = por %p1706_p8, %p1705_p4 }
  0x84   : > { %p1703_p6 = pneg %p1702_p1 }
  0x86   : > { %p1708_p12 = pnand %p1707_p11, %p1703_p6 }
  0x88   : > { %1711 = shalt.err (!%p1708_p12)
}
  0x89   : > { %s1712_s27 = scalar_lea.vmem %s424_s5, 128  ;;  %s1873_s10 = smov [#allocation7]  }
  0x8a   : > { %p1713_p7 = scmp.ne.s32.totalorder %s424_s5, %s1712_s27  ;;  %s1717_s13 = sshll.u32 %s1873_s10, 4  ;;  %s1718_s13 = int_to_ptr.vmem [resolvable:$false] %s1717_s13 }
  0x8b   : > { %s1719_s1 = scalar_lea.vmem %s1718_s13, 256  ;;  %p1720_p5 = scmp.lt.s32.totalorder %s424_s5, %s1718_s13 }
  0x8c   : > { %p1715_p0 = pnand %p1713_p7, %p2062_p10  ;;  %p1721_p2 = scmp.lt.s32.totalorder %s1719_s1, %s1712_s27 }
  0x8e   : > { %p1716_p3 = pneg %p1715_p0  ;;  %p1722_p13 = por %p1721_p2, %p1720_p5 }
  0x90   : > { %p1723_p1 = pnand %p1722_p13, %p1716_p3 }
  0x92   : > { %1726 = shalt.err (!%p1723_p1)
}
  0x93   : > { %1505 = dma.hbm_to_vmem [thread:$0]  (!%p2042_p9), %s2106_s14, 128, %s424_s5, %s2056_s26  }
  0x94   : > { %s2459_s8 = sand.u32 1, %s1865_s20   ;;  %s1727_s19 = scalar_lea.hbm %s2130_s30, 512 }
  0x95   : > { %s431_s11 = scalar_lea.sflag [#allocation9], %s2459_s8  ;;  %p1728_p6 = scmp.ne.s32.totalorder %s2130_s30, %s1727_s19 }
  0x96   : > { %s1732_s29 = scalar_lea.hbm %s2401_s3, 1024  ;;  %p1733_p11 = scmp.lt.s32.totalorder %s2130_s30, %s2401_s3 }
  0x97   : > { %p1730_p4 = pnand %p1728_p6, %p2062_p10  ;;  %p1734_p12 = scmp.lt.s32.totalorder %s1732_s29, %s1727_s19 }
  0x99   : > { %p1731_p8 = pneg %p1730_p4  ;;  %p1735_p7 = por %p1734_p12, %p1733_p11 }
  0x9b   : > { %p1736_p0 = pnand %p1735_p7, %p1731_p8 }
  0x9d   : > { %1739 = shalt.err (!%p1736_p0)
}
  0x9e   : > { %s1740_s26 = scalar_lea.vmem %s2082_s22, 512  ;;  %s1874_s14 = smov [#allocation8]  }
  0x9f   : > { %p1741_p3 = scmp.ne.s32.totalorder %s2082_s22, %s1740_s26  ;;  %s1745_s5 = sshll.u32 %s1874_s14, 4  ;;  %s1746_s5 = int_to_ptr.vmem [resolvable:$false] %s1745_s5 }
  0xa0   : > { %s1747_s9 = scalar_lea.vmem %s1746_s5, 1024  ;;  %p1748_p13 = scmp.lt.s32.totalorder %s2082_s22, %s1746_s5 }
  0xa1   : > { %p1743_p5 = pnand %p1741_p3, %p2062_p10  ;;  %p1749_p1 = scmp.lt.s32.totalorder %s1747_s9, %s1740_s26 }
  0xa3   : > { %p1744_p2 = pneg %p1743_p5  ;;  %p1750_p6 = por %p1749_p1, %p1748_p13 }
  0xa5   : > { %p1751_p4 = pnand %p1750_p6, %p1744_p2 }
  0xa7   : > { %1754 = shalt.err (!%p1751_p4)
}
  0xa8   : > { %1508 = dma.hbm_to_vmem [thread:$0]  (!%p2042_p9), %s2130_s30, 512, %s2082_s22, %s431_s11, %s2457_s7, %s2457_s7, %s2456_s6  }
  0xa9   : > { %p2460_p10 = scmp.ne.s32.totalorder %s2444_s25, 0 }
  0xaa   : > { %s2177_s17 = sand.u32 (!%p2460_p10), 1, %s1857_s18   ;;  %p2461_p8 = scmp.ne.s32.totalorder (!%p2460_p10), %s2441_s23, 0 }
  0xab   : > { %453 = sbr.rel (%p2460_p10) target bundleno = 2168 (0x878), region = 60  ;;  %s2180_s27 = sshll.u32 (!%p2460_p10), %s2177_s17, 3 }
  0xac   : > { %s456_s10 = scalar_lea.sflag (!%p2460_p10), [#allocation3], %s2177_s17  ;;  %s459_s12 = scalar_lea.vmem (!%p2460_p10), [#allocation2], %s2180_s27 }
  0xb0   : > { %1824 = dma.done.wait (%p2461_p8), %s456_s10, 128  }
  0xb1   : > { %1826 = vsyncadd (%p2461_p8), %s456_s10, 4294967168  ;;  %s464_s25 = sand.u32 1, %s1969_s21   ;;  %s468_s6 = scalar_lea.vmem [#allocation5], %s2180_s27 }
  0xb2   : > { %s465_s22 = scalar_lea.sflag [#allocation6], %s464_s25 }
  0xb3   : > { %1828 = dma.done.wait (%p2461_p8), %s465_s22, 256  }
  0xb4   : > { %1830 = vsyncadd (%p2461_p8), %s465_s22, 4294967040  ;;  %s1351_s7 = sshll.u32 %s2177_s17, 5  ;;  %s477_s30 = scalar_lea.vmem [#allocation7], %s2180_s27 }
  0xb5   : > { %s483_s13 = scalar_lea.sflag [#allocation9], %s464_s25  ;;  %s2198_s1 = scalar_lea.vmem [#allocation8], %s1351_s7 }
  0xb6   : > { %1832 = dma.done.wait (%p2461_p8), %s483_s13, 512  }
  0xb7   : > { %1834 = vsyncadd (%p2461_p8), %s483_s13, 4294966784  ;;  %p2462_p9 = scmp.eq.s32.totalorder %s1969_s21, 0 }
  0xb9   : > { %1836 = dma.done.wait (%p2462_p9), [#allocation9], 512   ;;  %p2463_p11 = pmov %p2462_p9 }
  0xba   : > { %p2464_p12 = pmov %p2462_p9 }
  0xbb   : > { %1838 = vsyncadd (%p2463_p11), [#allocation9], 4294966784 }
  0xbc   : > { %1840 = dma.done.wait (%p2464_p12), [#allocation12], 512   ;;  %p2465_p7 = pmov %p2462_p9 }
  0xbd   : > { %vm558_vm0 = vcmask 261120   ;;  %v555_v0 = vld [vmem:[%s459_s12] sm:$0xff]  ;;  %v556_v1 = vld [vmem:[%s468_s6] sm:$0xff]  ;;  %v1875_v15 = vmov 0.0   ;;  %vm1876_vm1 = vmmov 0   ;;  %s2466_s15 = sld [smem:[#allocation30_spill]] }
  0xbe   : > { %1842 = vsyncadd (%p2465_p7), [#allocation12], 4294966784  ;;  %v559_v2 = vsel %vm558_vm0, %v555_v0, 0.0  ;;  %v562_v3 = vsel %vm558_vm0, %v556_v1, 0.0  ;;  %v620_v14 = vld [vmem:[#allocation10 + $0x18] sm:$0xff]  ;;  %1413 = vmatprep.subr.mxu0 %v1875_v15  ;;  %v619_v16 = vld [vmem:[#allocation10 + $0x10] sm:$0xff]  ;;  %1421 = vmatprep.mubr.msk.f32.mxu0 %vm1876_vm1, %v1875_v15 }
  0xbf   : > { %560 = vadd.xlane.f32.xlu0 %v559_v2  ;;  %1414 = vmatpush3.msra.mxu0 %v620_v14  ;;  %v618_v17 = vld [vmem:[#allocation10 + $0x8] sm:$0xff]  ;;  %v617_v18 = vld [vmem:[#allocation10] sm:$0xff]  ;;  %v2225_v26 = vld [vmem:[%s2402_s4] ss:$0 sm:$0xff]  ;;  %s2467_s28 = sld [smem:[#allocation32_spill]]  ;;  %vm750_vm2 = vcmask 64512  }
  0xc0   : > { %1415 = vmatprep.subr.mxu0 %v1875_v15  ;;  %s1877_s16 = smov 112   ;;  %s1878_s26 = smov 104   ;;  %v557_v42 = vld [vmem:[%s477_s30] sm:$0xff]  ;;  %vm1022_vm3 = vcmask 130048   ;;  %vm1024_vm4 = vcmask 195584  }
  0xc1   : > { %1416 = vmatpush3.msra.mxu0 %v619_v16  ;;  %s1879_s14 = smov 120   ;;  %s1880_s5 = smov 96   ;;  %v565_v43 = vsel %vm558_vm0, %v557_v42, 0.0 }
  0xc2   : > { %1417 = vmatprep.subr.mxu0 %v1875_v15  ;;  %s1881_s9 = smov 64   ;;  %s2299_s10 = scalar_lea.vmem [#allocation14], %s1351_s7 }
  0xc3   : > { %563 = vadd.xlane.f32.xlu0 %v562_v3  ;;  %1418 = vmatpush3.msra.mxu0 %v618_v17  ;;  %v2230_v28 = vld [vmem:[%s2466_s15] ss:$0 sm:$0xff]  ;;  %s1882_s12 = smov 8   ;;  %s1883_s25 = smov 24  }
  0xc4   : > { %1419 = vmatprep.subr.mxu0 %v1875_v15  ;;  %s1884_s22 = smov 16   ;;  %s2468_s6 = sld [smem:[#allocation28_spill]] }
  0xc5   : > { %1420 = vmatpush3.msra.mxu0 %v617_v18  ;;  %v2245_v35 = vld [vmem:[%s2467_s28] ss:$0 sm:$0xff]  ;;  %s1384_s7 = sshll.u32 %s1969_s21, 9  ;;  %s1143_s30 = sshll.u32 %s2299_s10, 4  ;;  %s2326_s30 = int_to_ptr.vmem [resolvable:$true] %s1143_s30 }
  0xc6   : > { %v740_v18 = vld [vmem:[%s2198_s1 + $0x10] sm:$0xff]  ;;  %s2469_s23 = sld [smem:[#allocation36_spill]]  ;;  %s1117_s11 = scalar_lea.sflag [#allocation15], %s2177_s17 }
  0xc7   : > { %s1755_s19 = scalar_lea.vmem %s2326_s30, 512  ;;  %s1885_s15 = smov [#allocation14]  }
  0xc8   : > { %p1756_p0 = scmp.ne.s32.totalorder %s2326_s30, %s1755_s19  ;;  %s1759_s24 = sshll.u32 %s1885_s15, 4  ;;  %s1760_s24 = int_to_ptr.vmem [resolvable:$false] %s1759_s24 }
  0xc9   : > { %s1761_s29 = scalar_lea.vmem %s1760_s24, 1024  ;;  %p1762_p13 = scmp.lt.s32.totalorder %s2326_s30, %s1760_s24 }
  0xca   : > { %p2470_p3 = scmp.ne.s32.totalorder %s2468_s6, 0  ;;  %p1763_p1 = scmp.lt.s32.totalorder %s1761_s29, %s1755_s19 }
  0xcc   : > { %s2324_s8 = scalar_lea.hbm %s2469_s23, %s1384_s7  ;;  %p1757_p5 = pnand %p1756_p0, %p2470_p3 }
  0xcd   : > { %p1764_p6 = por %p1763_p1, %p1762_p13 }
  0xce   : > { %p1758_p2 = pneg %p1757_p5 }
  0xd0   : > { %p1765_p4 = pnand %p1764_p6, %p1758_p2 }
 0x148   : > { %v561_v4 = vpop.xlane.xlu0 %560 }
 0x149   : > { %v569_v5 = vmul.f32 0.03125, %v561_v4 }
 0x14b   : > { %v572_v6 = vsub.f32 %v555_v0, %v569_v5  ;;  %v739_v5 = vld [vmem:[%s2198_s1 + $0x8] sm:$0xff] }
 0x14c   : > { %v564_v7 = vpop.xlane.xlu0 %563 }
 0x14d   : > { %v570_v8 = vmul.f32 0.03125, %v564_v7  ;;  %v575_v9 = vmul.f32 %v572_v6, %v572_v6 }
 0x14f   : > { %v573_v10 = vsub.f32 %v556_v1, %v570_v8  ;;  %v578_v11 = vsel %vm558_vm0, %v575_v9, 0.0  ;;  %v738_v9 = vld [vmem:[%s2198_s1] sm:$0xff] }
 0x150   : > { %579 = vadd.xlane.f32.xlu1 %v578_v11 }
 0x151   : > { %v576_v12 = vmul.f32 %v573_v10, %v573_v10 }
 0x153   : > { %v581_v13 = vsel %vm558_vm0, %v576_v12, 0.0  ;;  %v741_v12 = vld [vmem:[%s2198_s1 + $0x18] sm:$0xff] }
 0x154   : > { %582 = vadd.xlane.f32.xlu1 %v581_v13 }
 0x1d9   : > { %v580_v19 = vpop.xlane.xlu1 %579 }
 0x1da   : > { %v587_v20 = vmul.f32 0.03125, %v580_v19 }
 0x1dc   : > { %v590_v21 = vadd.f32 1e-05, %v587_v20 }
 0x1dd   : > { %v583_v22 = vpop.xlane.xlu1 %582 }
 0x1de   : > { %1569 = vrsqrt.f32 %v590_v21  ;;  %v588_v23 = vmul.f32 0.03125, %v583_v22 }
 0x1e0   : > { %v591_v24 = vadd.f32 1e-05, %v588_v23 }
 0x1e2   : > { %1571 = vrsqrt.f32 %v591_v24 }
 0x1eb   : > { %v1570_v25 = vpop.eup %1569 }
 0x1ec   : > { %v596_v27 = vmul.f32 %v1570_v25, %v572_v6 }
 0x1ee   : > { %v605_v29 = vmul.f32 %v2225_v26, %v596_v27 }
 0x1ef   : > { %v1572_v30 = vpop.eup %1571 }
 0x1f0   : > { %v614_v31 = vadd.f32 %v2230_v28, %v605_v29  ;;  %v597_v32 = vmul.f32 %v1572_v30, %v573_v10 }
 0x1f2   : > { %1422 = vmatmul.mubr.msk.f32.vlgmr.msra.gmra.mxu0 %vm558_vm0, %v614_v31  ;;  %v606_v33 = vmul.f32 %v2225_v26, %v597_v32 }
 0x1f3   : > { %1424 = vmatprep.mubr.msk.f32.mxu0 %vm1876_vm1, %v1875_v15 }
 0x1f4   : > { %v615_v34 = vadd.f32 %v2230_v28, %v606_v33 }
 0x1f6   : > { %1425 = vmatmul.mubr.msk.f32.gmra.mxu0 %vm558_vm0, %v615_v34 }
 0x1f7   : > { %1427 = vmatprep.mubr.msk.f32.mxu0 %vm1876_vm1, %v1875_v15 }
 0x2b2   : > { %v703_v36 = vpop.f32.mrf.mxu0 }
 0x2b3   : > { %v704_v37 = vadd.f32 %v2245_v35, %v703_v36 }
 0x2b4   : > { %v1423_v38 = vpop.f32.mrf.mxu0 }
 0x2b5   : > { %1438 = vmatprep.mubr.msk.f32.mxu1 %vm750_vm2, %v704_v37 }
 0x2b6   : > { %v708_v39 = vpop.f32.mrf.mxu0 }
 0x2b7   : > { %v709_v40 = vadd.f32 %v2245_v35, %v708_v39 }
 0x2b8   : > { %v1426_v41 = vpop.f32.mrf.mxu0 }
 0x2b9   : > { %727 = vrot.lane.b32.xlu1 %v709_v40, %s1877_s16  ;;  %729 = vrot.lane.b32.xlu0 %v709_v40, %s1878_s26 }
 0x2bd   : > { %725 = vrot.lane.b32.xlu1 %v709_v40, %s1879_s14  ;;  %718 = vrot.lane.b32.xlu0 %v704_v37, %s1879_s14 }
 0x2c1   : > { %742 = vrot.lane.b32.xlu0 %v709_v40, %s1880_s5 }
 0x2e1   : > { %566 = vadd.xlane.f32.xlu1 %v565_v43 }
 0x32b   : > { %v730_v44 = vpop.permute.xlu0 %729  ;;  %v728_v45 = vpop.permute.xlu1 %727 }
 0x32c   : > { %748 = vrot.lane.b32.xlu0 %v730_v44, %s1880_s5 }
 0x32f   : > { %v726_v46 = vpop.permute.xlu1 %725  ;;  %v719_v52 = vpop.permute.xlu0 %718 }
 0x330   : > { %746 = vrot.lane.b32.xlu0 %v728_v45, %s1880_s5 }
 0x333   : > { %v743_v53 = vpop.permute.xlu0 %742 }
 0x334   : > { %744 = vrot.lane.b32.xlu0 %v726_v46, %s1880_s5 }
 0x338   : > { %720 = vrot.lane.b32.xlu0 %v704_v37, %s1877_s16 }
 0x33c   : > { %722 = vrot.lane.b32.xlu0 %v704_v37, %s1878_s26 }
 0x36a   : > { %v567_v47 = vpop.xlane.xlu1 %566 }
 0x36b   : > { %v571_v48 = vmul.f32 0.03125, %v567_v47 }
 0x36d   : > { %v574_v49 = vsub.f32 %v557_v42, %v571_v48 }
 0x36f   : > { %v577_v50 = vmul.f32 %v574_v49, %v574_v49 }
 0x371   : > { %v584_v51 = vsel %vm558_vm0, %v577_v50, 0.0 }
 0x372   : > { %585 = vadd.xlane.f32.xlu0 %v584_v51 }
 0x39e   : > { %v749_v54 = vpop.permute.xlu0 %748 }
 0x39f   : > { %1430 = vmatprep.subr.msk.mxu1 %vm750_vm2, %v749_v54 }
 0x3a0   : > { %1431 = vmatpush3.xpose.msk.msra.mxu1 %vm750_vm2, %v749_v54 }
 0x3a2   : > { %v747_v55 = vpop.permute.xlu0 %746 }
 0x3a3   : > { %1432 = vmatprep.subr.msk.mxu1 %vm750_vm2, %v747_v55 }
 0x3a4   : > { %1433 = vmatpush3.xpose.msk.msra.mxu1 %vm750_vm2, %v747_v55 }
 0x3a6   : > { %v745_v56 = vpop.permute.xlu0 %744 }
 0x3a7   : > { %1434 = vmatprep.subr.msk.mxu1 %vm750_vm2, %v745_v56 }
 0x3a8   : > { %1435 = vmatpush3.xpose.msk.msra.mxu1 %vm750_vm2, %v745_v56 }
 0x3a9   : > { %1436 = vmatprep.subr.msk.mxu1 %vm750_vm2, %v743_v53 }
 0x3aa   : > { %v721_v57 = vpop.permute.xlu0 %720 }
 0x3ac   : > { %1437 = vmatpush3.xpose.msk.msra.mxu1 %vm750_vm2, %v743_v53 }
 0x3ad   : > { %1458 = vmatprep.subr.mxu1 %v1875_v15 }
 0x3ae   : > { %v723_v58 = vpop.permute.xlu0 %722 }
 0x3af   : > { %1439 = vmatmul.mubr.msk.f32.vlgmr.msra.gmra.mxu1 %vm750_vm2, %v719_v52 }
 0x3b0   : > { %1441 = vmatprep.mubr.msk.f32.mxu1 %vm750_vm2, %v721_v57 }
 0x3b3   : > { %1442 = vmatmul.mubr.msk.f32.gmra.mxu1 %vm750_vm2, %v723_v58 }
 0x3b4   : > { %1466 = vmatprep.mubr.msk.f32.mxu1 %vm1876_vm1, %v1875_v15 }
 0x3fb   : > { %v586_v59 = vpop.xlane.xlu0 %585 }
 0x3fc   : > { %v589_v60 = vmul.f32 0.03125, %v586_v59 }
 0x3fe   : > { %v592_v61 = vadd.f32 1e-05, %v589_v60 }
 0x400   : > { %1573 = vrsqrt.f32 %v592_v61  ;;  %v1029_v61 = vld [vmem:[#allocation11 + $0x18] sm:$0xff] }
 0x401   : > { %1459 = vmatpush3.msra.mxu1 %v1029_v61 }
 0x402   : > { %1460 = vmatprep.subr.mxu1 %v1875_v15 }
 0x40d   : > { %v1574_v62 = vpop.eup %1573 }
 0x40e   : > { %v598_v63 = vmul.f32 %v1574_v62, %v574_v49  ;;  %v1028_v62 = vld [vmem:[#allocation11 + $0x10] sm:$0xff] }
 0x40f   : > { %1461 = vmatpush3.msra.mxu1 %v1028_v62 }
 0x410   : > { %v607_v0 = vmul.f32 %v2225_v26, %v598_v63  ;;  %1462 = vmatprep.subr.mxu1 %v1875_v15  ;;  %v1027_v63 = vld [vmem:[#allocation11 + $0x8] sm:$0xff] }
 0x411   : > { %1463 = vmatpush3.msra.mxu1 %v1027_v63 }
 0x412   : > { %v616_v1 = vadd.f32 %v2230_v28, %v607_v0  ;;  %1464 = vmatprep.subr.mxu1 %v1875_v15 }
 0x414   : > { %1428 = vmatmul.mubr.msk.f32.gmra.mxu0 %vm558_vm0, %v616_v1  ;;  %v1026_v1 = vld [vmem:[#allocation11] sm:$0xff] }
 0x415   : > { %1465 = vmatpush3.msra.mxu1 %v1026_v1 }
 0x46f   : > { %v1440_v6 = vpop.f32.mrf.mxu1 }
 0x470   : > { %v839_v7 = vadd.f32 %v1440_v6, %v739_v5 }
 0x471   : > { %v833_v8 = vpop.f32.mrf.mxu1 }
 0x472   : > { %v834_v10 = vadd.f32 %v833_v8, %v738_v9  ;;  %v855_v11 = vsel %vm558_vm0, %v839_v7, -inf }
 0x473   : > { %v1443_v13 = vpop.f32.mrf.mxu1 }
 0x474   : > { %v849_v14 = vadd.f32 %v1443_v13, %v741_v12  ;;  %v852_v16 = vsel %vm558_vm0, %v834_v10, -inf }
 0x475   : > { %v843_v17 = vpop.f32.mrf.mxu1 }
 0x476   : > { %v844_v19 = vadd.f32 %v843_v17, %v740_v18  ;;  %v861_v20 = vsel %vm558_vm0, %v849_v14, -inf }
 0x478   : > { %v858_v21 = vsel %vm558_vm0, %v844_v19, -inf }
 0x4d4   : > { %v713_v2 = vpop.f32.mrf.mxu0 }
 0x4d5   : > { %v714_v3 = vadd.f32 %v2245_v35, %v713_v2 }
 0x4d6   : > { %v1429_v4 = vpop.f32.mrf.mxu0 }
 0x4d7   : > { %734 = vrot.lane.b32.xlu0 %v714_v3, %s1877_s16  ;;  %736 = vrot.lane.b32.xlu1 %v714_v3, %s1878_s26 }
 0x4db   : > { %732 = vrot.lane.b32.xlu1 %v714_v3, %s1879_s14 }
 0x4ff   : > { %856 = vmax.xlane.f32.xlu1 %v855_v11 }
 0x503   : > { %853 = vmax.xlane.f32.xlu1 %v852_v16 }
 0x507   : > { %862 = vmax.xlane.f32.xlu1 %v861_v20 }
 0x50b   : > { %859 = vmax.xlane.f32.xlu1 %v858_v21 }
 0x549   : > { %v737_v22 = vpop.permute.xlu1 %736  ;;  %v735_v40 = vpop.permute.xlu0 %734 }
 0x54a   : > { %906 = vrot.lane.b32.xlu1 %v737_v22, %s1881_s9 }
 0x54d   : > { %v733_v23 = vpop.permute.xlu1 %732 }
 0x588   : > { %v857_v24 = vpop.xlane.xlu1 %856 }
 0x589   : > { %v865_v25 = vsub.f32 %v839_v7, %v857_v24 }
 0x58b   : > { %v870_v26 = vmul.f32 1.442695, %v865_v25 }
 0x58c   : > { %v854_v27 = vpop.xlane.xlu1 %853 }
 0x58d   : > { %1575 = vpow2.f32 %v870_v26  ;;  %v864_v28 = vsub.f32 %v834_v10, %v854_v27 }
 0x58f   : > { %v868_v29 = vmul.f32 1.442695, %v864_v28 }
 0x590   : > { %v863_v30 = vpop.xlane.xlu1 %862 }
 0x591   : > { %1577 = vpow2.f32 %v868_v29  ;;  %v867_v31 = vsub.f32 %v849_v14, %v863_v30 }
 0x593   : > { %v874_v32 = vmul.f32 1.442695, %v867_v31 }
 0x594   : > { %v860_v39 = vpop.xlane.xlu1 %859 }
 0x595   : > { %1579 = vpow2.f32 %v874_v32  ;;  %v866_v41 = vsub.f32 %v844_v19, %v860_v39 }
 0x597   : > { %v872_v43 = vmul.f32 1.442695, %v866_v41 }
 0x599   : > { %1581 = vpow2.f32 %v872_v43 }
 0x59a   : > { %v1576_v33 = vpop.eup %1575 }
 0x59b   : > { %v879_v34 = vsel %vm558_vm0, %v1576_v33, 0.0 }
 0x59c   : > { %880 = vadd.xlane.f32.xlu0 %v879_v34 }
 0x59e   : > { %v1578_v35 = vpop.eup %1577 }
 0x59f   : > { %v876_v36 = vsel %vm558_vm0, %v1578_v35, 0.0 }
 0x5a0   : > { %877 = vadd.xlane.f32.xlu1 %v876_v36 }
 0x5a2   : > { %v1580_v37 = vpop.eup %1579 }
 0x5a3   : > { %v885_v38 = vsel %vm558_vm0, %v1580_v37, 0.0 }
 0x5a4   : > { %886 = vadd.xlane.f32.xlu0 %v885_v38 }
 0x5a6   : > { %v1582_v44 = vpop.eup %1581 }
 0x5a7   : > { %v882_v45 = vsel %vm558_vm0, %v1582_v44, 0.0 }
 0x5b1   : > { %902 = vrot.lane.b32.xlu1 %v733_v23, %s1881_s9 }
 0x5ba   : > { %904 = vrot.lane.b32.xlu0 %v735_v40, %s1881_s9 }
 0x5bc   : > { %v907_v42 = vpop.permute.xlu1 %906 }
 0x5bd   : > { %1444 = vmatprep.subr.mxu0 %v907_v42 }
 0x5be   : > { %1445 = vmatpush3.msra.mxu0 %v907_v42 }
 0x5d5   : > { %883 = vadd.xlane.f32.xlu1 %v882_v45 }
 0x5e6   : > { %900 = vrot.lane.b32.xlu1 %v714_v3, %s1881_s9 }
 0x625   : > { %v881_v46 = vpop.xlane.xlu0 %880 }
 0x626   : > { %1583 = vrcp.f32 %v881_v46 }
 0x629   : > { %v878_v47 = vpop.xlane.xlu1 %877 }
 0x62a   : > { %1585 = vrcp.f32 %v878_v47 }
 0x62d   : > { %v887_v48 = vpop.xlane.xlu0 %886  ;;  %v903_v51 = vpop.permute.xlu1 %902 }
 0x62e   : > { %1587 = vrcp.f32 %v887_v48 }
 0x631   : > { %v905_v49 = vpop.permute.xlu0 %904 }
 0x632   : > { %1446 = vmatprep.subr.mxu0 %v905_v49 }
 0x633   : > { %v1584_v50 = vpop.eup %1583  ;;  %1447 = vmatpush3.msra.mxu0 %v905_v49 }
 0x634   : > { %v891_v52 = vmul.f32 %v1584_v50, %v1576_v33  ;;  %1448 = vmatprep.subr.mxu0 %v903_v51 }
 0x635   : > { %1449 = vmatpush3.msra.mxu0 %v903_v51 }
 0x636   : > { %897 = vst.msk [vmem:[%s2299_s10 + $0x8] sm:$0xff] %vm558_vm0, %v891_v52 }
 0x637   : > { %v1586_v53 = vpop.eup %1585 }
 0x638   : > { %v889_v54 = vmul.f32 %v1586_v53, %v1578_v35 }
 0x63a   : > { %896 = vst.msk [vmem:[%s2299_s10] sm:$0xff] %vm558_vm0, %v889_v54  ;;  %1452 = vmatprep.mubr.msk.f32.mxu0 %vm558_vm0, %v889_v54 }
 0x63b   : > { %v1588_v55 = vpop.eup %1587 }
 0x63c   : > { %v895_v56 = vmul.f32 %v1588_v55, %v1580_v37 }
 0x63e   : > { %899 = vst.msk [vmem:[%s2299_s10 + $0x18] sm:$0xff] %vm558_vm0, %v895_v56 }
 0x65e   : > { %v884_v57 = vpop.xlane.xlu1 %883 }
 0x65f   : > { %1589 = vrcp.f32 %v884_v57 }
 0x662   : > { %v901_v58 = vpop.permute.xlu1 %900 }
 0x663   : > { %1450 = vmatprep.subr.mxu0 %v901_v58 }
 0x664   : > { %1451 = vmatpush3.msra.mxu0 %v901_v58 }
 0x665   : > { %1453 = vmatmul.mubr.msk.f32.vlgmr.msra.gmra.mxu0 %vm558_vm0, %v891_v52 }
 0x66c   : > { %v1590_v59 = vpop.eup %1589 }
 0x66d   : > { %v893_v60 = vmul.f32 %v1590_v59, %v1582_v44 }
 0x66f   : > { %898 = vst.msk [vmem:[%s2299_s10 + $0x10] sm:$0xff] %vm558_vm0, %v893_v60  ;;  %1455 = vmatprep.mubr.msk.f32.mxu0 %vm558_vm0, %v893_v60 }
 0x670   : > { %1456 = vmatmul.mubr.msk.f32.gmra.mxu0 %vm558_vm0, %v895_v56 }
 0x725   : > { %v1454_v0 = vpop.f32.mrf.mxu0 }
 0x726   : > { %1010 = vrot.lane.b32.xlu1 %v1454_v0, %s1882_s12 }
 0x727   : > { %v990_v2 = vpop.f32.mrf.mxu0 }
 0x730   : > { %v1457_v3 = vpop.f32.mrf.mxu0 }
 0x731   : > { %1018 = vrot.lane.b32.xlu1 %v1457_v3, %s1883_s25 }
 0x732   : > { %v1000_v4 = vpop.f32.mrf.mxu0 }
 0x733   : > { %1014 = vrot.lane.b32.xlu0 %v1000_v4, %s1884_s22 }
 0x798   : > { %v1011_v5 = vpop.permute.xlu1 %1010 }
 0x799   : > { %v1021_v15 = vsel %vm750_vm2, %v990_v2, %v1011_v5 }
 0x7a3   : > { %v1019_v7 = vpop.permute.xlu1 %1018 }
 0x7a5   : > { %v1015_v6 = vpop.permute.xlu0 %1014 }
 0x7a6   : > { %v1023_v8 = vsel %vm1022_vm3, %v1021_v15, %v1015_v6 }
 0x7a7   : > { %v1025_v9 = vsel %vm1024_vm4, %v1023_v8, %v1019_v7 }
 0x7a8   : > { %1467 = vmatmul.mubr.msk.f32.vlgmr.msra.gmra.mxu1 %vm558_vm0, %v1025_v9 }
 0x7a9   : > { %1768 = shalt.err (!%p1765_p4)
}
 0x7aa   : > { %s1769_s28 = scalar_lea.hbm %s2324_s8, 512  ;;  %s1773_s14 = scalar_lea.hbm %s2469_s23, 1024 }
 0x7ab   : > { %p1770_p10 = scmp.ne.s32.totalorder %s2324_s8, %s1769_s28  ;;  %p1774_p11 = scmp.lt.s32.totalorder %s2324_s8, %s2469_s23 }
 0x7ac   : > { %p1775_p12 = scmp.lt.s32.totalorder %s1773_s14, %s1769_s28 }
 0x7ad   : > { %p1771_p8 = pnand %p1770_p10, %p2470_p3 }
 0x7ae   : > { %p1776_p7 = por %p1775_p12, %p1774_p11 }
 0x7af   : > { %p1772_p9 = pneg %p1771_p8 }
 0x7b1   : > { %p1777_p0 = pnand %p1776_p7, %p1772_p9 }
 0x7b3   : > { %1780 = shalt.err (!%p1777_p0)
}
 0x7b4   : > { %s1886_s10 = smov 128   ;;  %s2471_s7 = sld [smem:[#allocation34_spill]] }
 0x7b5   : > { %1486 = dma.vmem_to_hbm [thread:$0]  (%p2470_p3), %s2326_s30, 512, %s2324_s8, %s1117_s11, %s1886_s10, %s1886_s10, %s1882_s12  }
 0x7b6   : > { %s1378_s13 = sshll.u32 %s1969_s21, 7  ;;  %s545_s1 = scalar_lea.vmem [#allocation13], %s2180_s27 }
 0x7b7   : > { %s1130_s19 = sshll.u32 %s545_s1, 4  ;;  %s2472_s29 = sld [smem:[#allocation35_spill]]  ;;  %s1131_s19 = int_to_ptr.vmem [resolvable:$true] %s1130_s19 }
 0x7b8   : > { %s1112_s16 = scalar_lea.sflag [#allocation4], %s2177_s17  ;;  %s1781_s12 = scalar_lea.vmem %s1131_s19, 128 }
 0x7b9   : > { %p1782_p5 = scmp.ne.s32.totalorder %s1131_s19, %s1781_s12  ;;  %s1887_s21 = smov [#allocation13]  }
 0x7ba   : > { %v1374_v10 = vld [vmem:[%s2471_s7] ss:$0 sm:$0xff]  ;;  %s1785_s27 = sshll.u32 %s1887_s21, 4  ;;  %s1786_s27 = int_to_ptr.vmem [resolvable:$false] %s1785_s27 }
 0x7bb   : > { %p1783_p2 = pnand %p1782_p5, %p2470_p3  ;;  %s1787_s30 = scalar_lea.vmem %s1786_s27, 256 }
 0x7bc   : > { %p1788_p1 = scmp.lt.s32.totalorder %s1131_s19, %s1786_s27  ;;  %p1789_p6 = scmp.lt.s32.totalorder %s1787_s30, %s1781_s12 }
 0x7bd   : > { %s2360_s28 = scalar_lea.hbm %s2472_s29, %s1378_s13  ;;  %p1784_p13 = pneg %p1783_p2 }
 0x7be   : > { %p1790_p4 = por %p1789_p6, %p1788_p1 }
 0x7c0   : > { %p1791_p10 = pnand %p1790_p4, %p1784_p13 }
 0x868   : > { %v1106_v11 = vpop.f32.mrf.mxu1 }
 0x869   : > { %v1107_v12 = vadd.f32 %v1374_v10, %v1106_v11 }
 0x86a   : > { %v1468_v13 = vpop.f32.mrf.mxu1 }
 0x86b   : > { %1110 = vst.msk [vmem:[%s545_s1] sm:$0xff] %vm558_vm0, %v1107_v12 }
 0x86c   : > { %1794 = shalt.err (!%p1791_p10)
}
 0x86d   : > { %s1795_s8 = scalar_lea.hbm %s2360_s28, 128  ;;  %s1799_s26 = scalar_lea.hbm %s2472_s29, 256 }
 0x86e   : > { %p1796_p8 = scmp.ne.s32.totalorder %s2360_s28, %s1795_s8  ;;  %p1800_p12 = scmp.lt.s32.totalorder %s2360_s28, %s2472_s29 }
 0x86f   : > { %p1801_p7 = scmp.lt.s32.totalorder %s1799_s26, %s1795_s8 }
 0x870   : > { %p1797_p9 = pnand %p1796_p8, %p2470_p3 }
 0x871   : > { %p1802_p0 = por %p1801_p7, %p1800_p12 }
 0x872   : > { %p1798_p11 = pneg %p1797_p9 }
 0x874   : > { %p1803_p5 = pnand %p1802_p0, %p1798_p11 }
 0x876   : > { %1806 = shalt.err (!%p1803_p5)
}
 0x877   : > { %1485 = dma.vmem_to_hbm [thread:$0]  (%p2470_p3), %s1131_s19, 128, %s2360_s28, %s1112_s16  }
 0x878 PF: > { %s2473_s9 = sld [smem:[#allocation23_spill]]  ;;  %p2476_p13 = scmp.ge.s32.totalorder %s1865_s20, 2 }
 0x879   : > { %s2474_s10 = sld [smem:[#allocation25_spill]] }
 0x87e   : > { %s1158_s25 = sand.u32 1, %s2473_s9  }
 0x87f   : > { %p2475_p2 = scmp.ne.s32.totalorder %s2474_s10, 0  ;;  %s1159_s22 = scalar_lea.sflag [#allocation4], %s1158_s25 }
 0x881   : > { %p1510_p1 = pnand %p2476_p13, %p2475_p2 }
 0x883   : > { %p1511_p6 = pneg %p1510_p1 }
 0x885   : > { %1844 = dma.done.wait (%p1511_p6), %s1159_s22, 128  }
 0x886   : > { %1846 = vsyncadd (%p1511_p6), %s1159_s22, 4294967168  ;;  %s1168_s7 = scalar_lea.sflag [#allocation15], %s1158_s25 }
 0x887   : > { %1848 = dma.done.wait (%p1511_p6), %s1168_s7, 512  }
 0x888   : > { %1850 = vsyncadd (%p1511_p6), %s1168_s7, 4294966784  ;;  %s2477_s20 = sld [smem:[#allocation26_spill]]  ;;  %s2480_s17 = smov %s1857_s18 }
 0x889   : > { %s2478_s6 = sld [smem:[#allocation24_spill]] }
 0x88a   : > { %s2479_s19 = sld [smem:[#allocation27_spill]] }
 0x88e   : > { %p35_p3 = scmp.ge.s32.totalorder %s2477_s20, 4  }
 0x88f   : > { %s2481_s18 = smov %s2478_s6 }
 0x890   :  { %37 = sbr.rel (!%p35_p3) target bundleno = 21 (0x15), region = 167 }
 0x895   :  { %1173 = vsyncpa [#allocation3], 1 }
 0x896   :  { %1175 = vsyncpa [#allocation3 + $0x1], 1 }
 0x897   :  { %1176 = vsyncpa [#allocation6], 1 }
 0x898   :  { %1178 = vsyncpa [#allocation6 + $0x1], 1 }
 0x899   :  { %1179 = vsyncpa [#allocation9], 1 }
 0x89a   :  { %1181 = vsyncpa [#allocation9 + $0x1], 1 }
 0x89b   :  { %1182 = vsyncpa [#allocation12], 1 }
 0x89c   :  { %1183 = vsyncpa [#allocation4], 1 }
 0x89d   :  { %1185 = vsyncpa [#allocation4 + $0x1], 1 }
 0x89e   :  { %1186 = vsyncpa [#allocation15], 1 }
 0x89f   :  { %1188 = vsyncpa [#allocation15 + $0x1], 1 }

</bundles_post_ra>
